<compile_context>
chip_gen: v5e
topology: v5e:2x2
jax: 0.10.0
libtpu: 0.0.40
codegen_flags: <defaults>
</compile_context>

<pallas_src>
import numpy as np
import jax
import jax.numpy as jnp
from jax import lax
from jax.experimental import pallas as pl
from jax.experimental.pallas import tpu as pltpu


def mlp_kernel(x_ref, w1_ref, b1_ref, w2_ref, b2_ref, w3_ref, b3_ref, o_ref):
    """Fused 3-layer MLP.

    x_ref  : (block_m, in_shape)  -- natural PyTorch layout, no wrapper transpose
    w1_ref : (hidden, in_shape)   -- PyTorch (out, in) layout
    w2_ref : (hidden, hidden)
    w3_ref : (1, hidden)          -- final layer, PyTorch layout, used directly on the MXU
    b1/b2  : (hidden, 1), b3 : (1,) scalar in SMEM
    o_ref  : (1, block_m)         -- lane-dense output row
    """
    x = x_ref[...]                                                    # (bm, in)
    # Layer 1: contract the feature axis of x against the feature axis of W1 -> (hidden, bm).
    h1 = lax.dot_general(w1_ref[...], x, (((1,), (1,)), ((), ())),
                         preferred_element_type=jnp.float32) + b1_ref[...]
    h1 = jnp.maximum(h1, 0.0)                                         # (hidden, bm)
    # Layer 2: (hidden, hidden) x (hidden, bm) on the MXU.
    h2 = jnp.dot(w2_ref[...], h1, preferred_element_type=jnp.float32) + b2_ref[...]
    h2 = jnp.maximum(h2, 0.0)                                         # (hidden, bm)
    # Layer 3 (N=1) also on the MXU: (1, hidden) x (hidden, bm) -> lane-dense (1, bm) row.
    out_row = jnp.dot(w3_ref[...], h2, preferred_element_type=jnp.float32) + b3_ref[0]
    o_ref[...] = out_row.astype(o_ref.dtype)


def mse_model_forward(x, params, *, block_m=None):
    """Pallas forward pass of mse_model. x: [batch, in_shape] -> [batch]."""
    w1, b1, w2, b2, w3, b3 = params
    batch, in_shape = x.shape
    hidden = w1.shape[0]

    # Lane-dense, step-amortizing tiling: block_m is a multiple of 128, capped at 2048.
    lane_padded_batch = int(pl.cdiv(batch, 128)) * 128
    if block_m is None:
        block_m = min(2048, lane_padded_batch)
    assert block_m % 128 == 0, "block_m must be a multiple of 128 for lane-dense stores"

    # Pad batch (with zero rows) up to a multiple of block_m; sliced off after the call.
    padded_batch = int(pl.cdiv(batch, block_m)) * block_m
    if padded_batch != batch:
        x = jnp.pad(x, ((0, padded_batch - batch), (0, 0)))
    num_blocks = padded_batch // block_m

    # Shard the grid across TensorCores as soon as there are >=2 blocks (v7x has 2 TCs).
    dim_sem = ("parallel",) if num_blocks >= 2 else ("arbitrary",)

    out = pl.pallas_call(
        mlp_kernel,
        out_shape=jax.ShapeDtypeStruct((1, padded_batch), jnp.float32),
        grid_spec=pltpu.PrefetchScalarGridSpec(
            num_scalar_prefetch=0,
            grid=(num_blocks,),
            in_specs=[
                pl.BlockSpec((block_m, in_shape), lambda i: (i, 0)),   # x tile (natural layout)
                pl.BlockSpec((hidden, in_shape), lambda i: (0, 0)),    # W1 (resident)
                pl.BlockSpec((hidden, 1), lambda i: (0, 0)),           # b1
                pl.BlockSpec((hidden, hidden), lambda i: (0, 0)),      # W2 (resident)
                pl.BlockSpec((hidden, 1), lambda i: (0, 0)),           # b2
                pl.BlockSpec((1, hidden), lambda i: (0, 0)),           # W3 (PyTorch layout)
                pl.BlockSpec(memory_space=pltpu.MemorySpace.SMEM),     # b3 scalar
            ],
            out_specs=pl.BlockSpec((1, block_m), lambda i: (0, i)),
        ),
        compiler_params=pltpu.CompilerParams(dimension_semantics=dim_sem),
    )(x, w1, b1, w2, b2, w3, b3)

    # torch.squeeze of the (batch, 1) output -> (batch,); drop the lane padding.
    return out.reshape(padded_batch)[:batch]


def init_params(key, in_shape, hidden_size):
    """Mirror mse_model.init_weights(): orthogonal weights, zero biases.
    Weights kept in PyTorch (out, in) layout throughout."""
    k1, k2, k3 = jax.random.split(key, 3)
    ortho = jax.nn.initializers.orthogonal()
    w1 = ortho(k1, (hidden_size, in_shape), jnp.float32)     # (hidden, in)
    w2 = ortho(k2, (hidden_size, hidden_size), jnp.float32)  # (hidden, hidden)
    w3 = ortho(k3, (1, hidden_size), jnp.float32)            # (1, hidden)
    b1 = jnp.zeros((hidden_size, 1), jnp.float32)
    b2 = jnp.zeros((hidden_size, 1), jnp.float32)
    b3 = jnp.zeros((1,), jnp.float32)
    return (w1, b1, w2, b2, w3, b3)


def reference_forward(x, params):
    w1, b1, w2, b2, w3, b3 = params
    h1 = jnp.maximum(x @ w1.T + b1[:, 0], 0.0)
    h2 = jnp.maximum(h1 @ w2.T + b2[:, 0], 0.0)
    return h2 @ w3[0] + b3[0]


if __name__ == "__main__":
    key = jax.random.PRNGKey(0)
    in_shape = 4
    hidden_size = 32
    batch = 64   # padded to 128 inside the wrapper for lane-dense tiles, sliced back

    kp, kx = jax.random.split(key)
    params = init_params(kp, in_shape, hidden_size)
    x = jax.random.normal(kx, (batch, in_shape), jnp.float32)

    y = mse_model_forward(x, params)
    y = jax.block_until_ready(y)

    y_ref = reference_forward(x, params)
    np.testing.assert_allclose(np.asarray(y), np.asarray(y_ref), rtol=1e-5, atol=1e-5)
    assert y.shape == (batch,)

    print("KERNEL_OK")
</pallas_src>

<mosaic_0001>
module attributes {stable_mosaic.version = 11 : i64} {
  func.func @mlp_kernel(%arg0: i32, %arg1: memref<128x4xf32, #tpu.memory_space<vmem>>, %arg2: memref<32x4xf32, #tpu.memory_space<vmem>>, %arg3: memref<32x1xf32, #tpu.memory_space<vmem>>, %arg4: memref<32x32xf32, #tpu.memory_space<vmem>>, %arg5: memref<32x1xf32, #tpu.memory_space<vmem>>, %arg6: memref<1x32xf32, #tpu.memory_space<vmem>>, %arg7: memref<1xf32, #tpu.memory_space<smem>>, %arg8: memref<1x128xf32, #tpu.memory_space<vmem>>) attributes {dimension_semantics = [#tpu.dimension_semantics<arbitrary>], iteration_bounds = array<i64: 1>, scalar_prefetch = 0 : i64, scratch_operands = 0 : i64, tpu.core_type = #tpu.core_type<tc>, window_params = [{transform_indices = @transform_0, window_bounds = array<i64: 128, 4>}, {pipeline_mode = #tpu.pipeline_mode<synchronous>, transform_indices = @transform_1, window_bounds = array<i64: 32, 4>}, {pipeline_mode = #tpu.pipeline_mode<synchronous>, transform_indices = @transform_2, window_bounds = array<i64: 32, 1>}, {pipeline_mode = #tpu.pipeline_mode<synchronous>, transform_indices = @transform_3, window_bounds = array<i64: 32, 32>}, {pipeline_mode = #tpu.pipeline_mode<synchronous>, transform_indices = @transform_4, window_bounds = array<i64: 32, 1>}, {pipeline_mode = #tpu.pipeline_mode<synchronous>, transform_indices = @transform_5, window_bounds = array<i64: 1, 32>}, {transform_indices = @transform_6, window_bounds = array<i64: 1>}, {transform_indices = @transform_7, window_bounds = array<i64: 1, 128>}]} {
    %c0 = arith.constant 0 : index
    %c0_0 = arith.constant 0 : index
    %0 = vector.load %arg1[%c0, %c0_0] : memref<128x4xf32, #tpu.memory_space<vmem>>, vector<128x4xf32>
    %c0_1 = arith.constant 0 : index
    %c0_2 = arith.constant 0 : index
    %1 = vector.load %arg2[%c0_1, %c0_2] : memref<32x4xf32, #tpu.memory_space<vmem>>, vector<32x4xf32>
    %cst = arith.constant dense<0.000000e+00> : vector<32x128xf32>
    %2 = tpu.matmul %1, %0, %cst {dimension_numbers = #tpu.dot_dimension_numbers<[1], [1], [0], [0], [0, 0, 1, 0], [], []>} : vector<32x4xf32>, vector<128x4xf32>, vector<32x128xf32> -> vector<32x128xf32>
    %c0_3 = arith.constant 0 : index
    %c0_4 = arith.constant 0 : index
    %3 = vector.load %arg3[%c0_3, %c0_4] : memref<32x1xf32, #tpu.memory_space<vmem>>, vector<32x1xf32>
    %4 = vector.broadcast %3 : vector<32x1xf32> to vector<32x128xf32>
    %5 = arith.addf %2, %4 : vector<32x128xf32>
    %cst_5 = arith.constant 0.000000e+00 : f32
    %6 = vector.broadcast %cst_5 : f32 to vector<32x128xf32>
    %7 = arith.maximumf %5, %6 : vector<32x128xf32>
    %c0_6 = arith.constant 0 : index
    %c0_7 = arith.constant 0 : index
    %8 = vector.load %arg4[%c0_6, %c0_7] : memref<32x32xf32, #tpu.memory_space<vmem>>, vector<32x32xf32>
    %cst_8 = arith.constant dense<0.000000e+00> : vector<32x128xf32>
    %9 = tpu.matmul %8, %7, %cst_8 {dimension_numbers = #tpu.dot_dimension_numbers<[1], [0], [0], [1], [0, 0, 1, 1], [], []>} : vector<32x32xf32>, vector<32x128xf32>, vector<32x128xf32> -> vector<32x128xf32>
    %c0_9 = arith.constant 0 : index
    %c0_10 = arith.constant 0 : index
    %10 = vector.load %arg5[%c0_9, %c0_10] : memref<32x1xf32, #tpu.memory_space<vmem>>, vector<32x1xf32>
    %11 = vector.broadcast %10 : vector<32x1xf32> to vector<32x128xf32>
    %12 = arith.addf %9, %11 : vector<32x128xf32>
    %cst_11 = arith.constant 0.000000e+00 : f32
    %13 = vector.broadcast %cst_11 : f32 to vector<32x128xf32>
    %14 = arith.maximumf %12, %13 : vector<32x128xf32>
    %c0_12 = arith.constant 0 : index
    %c0_13 = arith.constant 0 : index
    %15 = vector.load %arg6[%c0_12, %c0_13] : memref<1x32xf32, #tpu.memory_space<vmem>>, vector<1x32xf32>
    %cst_14 = arith.constant dense<0.000000e+00> : vector<1x128xf32>
    %16 = tpu.matmul %15, %14, %cst_14 {dimension_numbers = #tpu.dot_dimension_numbers<[1], [0], [0], [1], [0, 0, 1, 1], [], []>} : vector<1x32xf32>, vector<32x128xf32>, vector<1x128xf32> -> vector<1x128xf32>
    %c0_15 = arith.constant 0 : index
    %17 = memref.load %arg7[%c0_15] : memref<1xf32, #tpu.memory_space<smem>>
    %18 = vector.broadcast %17 : f32 to vector<1x128xf32>
    %19 = arith.addf %16, %18 : vector<1x128xf32>
    %c0_16 = arith.constant 0 : index
    %c0_17 = arith.constant 0 : index
    %20 = vector.load %arg8[%c0_16, %c0_17] : memref<1x128xf32, #tpu.memory_space<vmem>>, vector<1x128xf32>
    tpu.vector_store %arg8[%c0_16, %c0_17], %19 {strides = array<i32>} : memref<1x128xf32, #tpu.memory_space<vmem>>, vector<1x128xf32>,
    return
  }
  func.func @transform_0(%arg0: i32) -> (i32, i32) {
    %c0_i32 = arith.constant 0 : i32
    %c0_i32_0 = arith.constant 0 : i32
    return %arg0, %c0_i32 : i32, i32
  }
  func.func @transform_1(%arg0: i32) -> (i32, i32) {
    %c0_i32 = arith.constant 0 : i32
    %c0_i32_0 = arith.constant 0 : i32
    %c0_i32_1 = arith.constant 0 : i32
    return %c0_i32, %c0_i32_0 : i32, i32
  }
  func.func @transform_2(%arg0: i32) -> (i32, i32) {
    %c0_i32 = arith.constant 0 : i32
    %c0_i32_0 = arith.constant 0 : i32
    %c0_i32_1 = arith.constant 0 : i32
    return %c0_i32, %c0_i32_0 : i32, i32
  }
  func.func @transform_3(%arg0: i32) -> (i32, i32) {
    %c0_i32 = arith.constant 0 : i32
    %c0_i32_0 = arith.constant 0 : i32
    %c0_i32_1 = arith.constant 0 : i32
    return %c0_i32, %c0_i32_0 : i32, i32
  }
  func.func @transform_4(%arg0: i32) -> (i32, i32) {
    %c0_i32 = arith.constant 0 : i32
    %c0_i32_0 = arith.constant 0 : i32
    %c0_i32_1 = arith.constant 0 : i32
    return %c0_i32, %c0_i32_0 : i32, i32
  }
  func.func @transform_5(%arg0: i32) -> (i32, i32) {
    %c0_i32 = arith.constant 0 : i32
    %c0_i32_0 = arith.constant 0 : i32
    %c0_i32_1 = arith.constant 0 : i32
    return %c0_i32, %c0_i32_0 : i32, i32
  }
  func.func @transform_6(%arg0: i32) -> i32 {
    %c0_i32 = arith.constant 0 : i32
    %c0_i32_0 = arith.constant 0 : i32
    return %c0_i32 : i32
  }
  func.func @transform_7(%arg0: i32) -> (i32, i32) {
    %c0_i32 = arith.constant 0 : i32
    %c0_i32_0 = arith.constant 0 : i32
    return %c0_i32, %arg0 : i32, i32
  }
}

</mosaic_0001>

<bundles_post_ra>
// kernel: tpu_custom_call.1
= control target key start
LH: loop header
LB: loop body
LE: loop exit
PB: predicated region body
PF: predicated region fallthrough
CT: control target
= control target key end

     0   :  { %vm72_vm0 = vcmask 31744   ;;  %s543_s0 = inlined_call_operand.vmem [shape: f32[128,4], index: 0, kind: input, shape index: {}]   ;;  %s544_s1 = inlined_call_operand.vmem [shape: f32[32,4], index: 1, kind: input, shape index: {}]   ;;  %s545_s2 = inlined_call_operand.vmem [shape: f32[32,1], index: 2, kind: input, shape index: {}]   ;;  %s546_s3 = inlined_call_operand.vmem [shape: f32[32,32], index: 3, kind: input, shape index: {}]   ;;  %s547_s4 = inlined_call_operand.vmem [shape: f32[32,1], index: 4, kind: input, shape index: {}]   ;;  %s548_s5 = inlined_call_operand.vmem [shape: f32[1,32], index: 5, kind: input, shape index: {}]   ;;  %s549_s6 = inlined_call_operand.<no memory space> [shape: f32[1], index: 6, kind: input, shape index: {}]   ;;  %s550_s7 = inlined_call_operand.hbm [shape: f32[1,128], index: 7, kind: output, shape index: {}]  }
   0x1   :  { %v43_v0 = vld [vmem:[%s543_s0 + $0x78] sm:$0xff]  ;;  %v42_v1 = vld [vmem:[%s543_s0 + $0x70] sm:$0xff] }
   0x2   :  { %308 = vmatpush.xpose.msk.msra.mxu3 %vm72_vm0, %v43_v0  ;;  %283 = vmatpush.xpose.msk.msra.mxu0 %vm72_vm0, %v43_v0 }
   0x3   :  { %13 = vsyncpa [#allocation4], 0  ;;  %v41_v2 = vld [vmem:[%s543_s0 + $0x68] sm:$0xff]  ;;  %v40_v3 = vld [vmem:[%s543_s0 + $0x60] sm:$0xff]  ;;  %v355_v14 = vmov 0   ;;  %vm194_vm1 = vcmask 261120  }
   0x4   :  { %v39_v4 = vld [vmem:[%s543_s0 + $0x58] sm:$0xff]  ;;  %v38_v5 = vld [vmem:[%s543_s0 + $0x50] sm:$0xff]  ;;  %v37_v6 = vld [vmem:[%s543_s0 + $0x48] sm:$0xff]  ;;  %326 = vset.pattern.permute.xlu0 %v355_v14  ;;  %327 = vset.pattern.permute.xlu1 %v355_v14  ;;  %s356_s17 = smov [#allocation3]   ;;  %s274_s21 = sshll.u32 %s550_s7, 4  ;;  %s275_s21 = int_to_ptr.hbm [resolvable:$true] %s274_s21 }
   0x5   :  { %v36_v7 = vld [vmem:[%s543_s0 + $0x40] sm:$0xff]  ;;  %v35_v8 = vld [vmem:[%s543_s0 + $0x38] sm:$0xff]  ;;  %v34_v9 = vld [vmem:[%s543_s0 + $0x30] sm:$0xff]  ;;  %328 = vset.pattern.permute.xlu2 %v355_v14  ;;  %s272_s18 = sshll.u32 %s356_s17, 4  ;;  %s273_s18 = int_to_ptr.vmem [resolvable:$true] %s272_s18 }
   0x6   :  { %309 = vmatpush.xpose.msk.msra.mxu3 %vm72_vm0, %v42_v1  ;;  %284 = vmatpush.xpose.msk.msra.mxu0 %vm72_vm0, %v42_v1  ;;  %v33_v10 = vld [vmem:[%s543_s0 + $0x28] sm:$0xff]  ;;  %v51_v11 = vld [vmem:[%s545_s2 + $0x18] sm:$0xff]  ;;  %v32_v13 = vld [vmem:[%s543_s0 + $0x20] sm:$0xff] }
   0x7   :  { %v49_v12 = vld [vmem:[%s545_s2 + $0x8] sm:$0xff]  ;;  %69 = vperm.xlu0 %326, %v51_v11   ;;  %v31_v15 = vld [vmem:[%s543_s0 + $0x18] sm:$0xff]  ;;  %v50_v16 = vld [vmem:[%s545_s2 + $0x10] sm:$0xff] }
   0x8   :  { %59 = vperm.xlu1 %327, %v49_v12   ;;  %v48_v17 = vld [vmem:[%s545_s2] sm:$0xff]  ;;  %v30_v18 = vld [vmem:[%s543_s0 + $0x10] sm:$0xff]  ;;  %v29_v19 = vld [vmem:[%s543_s0 + $0x8] sm:$0xff] }
   0x9   :  { %v171_v20 = vld [vmem:[%s547_s4 + $0x8] sm:$0xff]  ;;  %v170_v21 = vld [vmem:[%s547_s4] sm:$0xff]  ;;  %v46_v25 = vld [vmem:[%s544_s1 + $0x10] sm:$0xff] }
   0xa   :  { %310 = vmatpush.xpose.msk.msra.mxu3 %vm72_vm0, %v41_v2  ;;  %285 = vmatpush.xpose.msk.msra.mxu0 %vm72_vm0, %v41_v2  ;;  %v28_v22 = vld [vmem:[%s543_s0] sm:$0xff]  ;;  %v45_v23 = vld [vmem:[%s544_s1 + $0x8] sm:$0xff]  ;;  %v47_v26 = vld [vmem:[%s544_s1 + $0x18] sm:$0xff]  ;;  %v242_v2 = vstv %s549_s6 }
   0xb   :  { %v44_v24 = vld [vmem:[%s544_s1] sm:$0xff]  ;;  %v173_v39 = vld [vmem:[%s547_s4 + $0x18] sm:$0xff]  ;;  %v172_v45 = vld [vmem:[%s547_s4 + $0x10] sm:$0xff] }
   0xc   :  { %191 = vperm.xlu2 %328, %v173_v39   ;;  %v166_v44 = vld [vmem:[%s546_s3] sm:$0xff]  ;;  %v167_v46 = vld [vmem:[%s546_s3 + $0x8] sm:$0xff]  ;;  %v168_v47 = vld [vmem:[%s546_s3 + $0x10] sm:$0xff] }
   0xd   :  { %v169_v48 = vld [vmem:[%s546_s3 + $0x18] sm:$0xff]  ;;  %v240_v1 = vld [vmem:[%s548_s5] sm:$0x1] }
   0xe   :  { %311 = vmatpush.xpose.msk.msra.mxu3 %vm72_vm0, %v40_v3  ;;  %286 = vmatpush.xpose.msk.msra.mxu0 %vm72_vm0, %v40_v3 }
   0xf   :  { %64 = vperm.xlu0 %326, %v50_v16  }
  0x10   :  { %54 = vperm.xlu1 %327, %v48_v17  }
  0x12   :  { %312 = vmatpush.xpose.msk.msra.mxu3 %vm72_vm0, %v39_v4  ;;  %287 = vmatpush.xpose.msk.msra.mxu0 %vm72_vm0, %v39_v4 }
  0x14   :  { %186 = vperm.xlu2 %328, %v172_v45  }
  0x16   :  { %313 = vmatpush.xpose.msk.msra.mxu3 %vm72_vm0, %v38_v5  ;;  %288 = vmatpush.xpose.msk.msra.mxu0 %vm72_vm0, %v38_v5 }
  0x17   :  { %181 = vperm.xlu0 %326, %v171_v20  }
  0x18   :  { %176 = vperm.xlu1 %327, %v170_v21  }
  0x1a   :  { %314 = vmatpush.xpose.msk.msra.mxu3 %vm72_vm0, %v37_v6  ;;  %289 = vmatpush.xpose.msk.msra.mxu0 %vm72_vm0, %v37_v6 }
  0x1e   :  { %315 = vmatpush.xpose.msk.msra.mxu3 %vm72_vm0, %v36_v7  ;;  %290 = vmatpush.xpose.msk.msra.mxu0 %vm72_vm0, %v36_v7 }
  0x22   :  { %316 = vmatpush.xpose.msk.msra.mxu3 %vm72_vm0, %v35_v8  ;;  %291 = vmatpush.xpose.msk.msra.mxu0 %vm72_vm0, %v35_v8 }
  0x26   :  { %317 = vmatpush.xpose.msk.msra.mxu3 %vm72_vm0, %v34_v9  ;;  %292 = vmatpush.xpose.msk.msra.mxu0 %vm72_vm0, %v34_v9 }
  0x2a   :  { %318 = vmatpush.xpose.msk.msra.mxu3 %vm72_vm0, %v33_v10  ;;  %293 = vmatpush.xpose.msk.msra.mxu0 %vm72_vm0, %v33_v10 }
  0x2e   :  { %319 = vmatpush.xpose.msk.msra.mxu3 %vm72_vm0, %v32_v13  ;;  %294 = vmatpush.xpose.msk.msra.mxu0 %vm72_vm0, %v32_v13 }
  0x32   :  { %320 = vmatpush.xpose.msk.msra.mxu3 %vm72_vm0, %v31_v15  ;;  %295 = vmatpush.xpose.msk.msra.mxu0 %vm72_vm0, %v31_v15 }
  0x36   :  { %321 = vmatpush.xpose.msk.msra.mxu3 %vm72_vm0, %v30_v18  ;;  %296 = vmatpush.xpose.msk.msra.mxu0 %vm72_vm0, %v30_v18 }
  0x3a   :  { %322 = vmatpush.xpose.msk.msra.mxu3 %vm72_vm0, %v29_v19  ;;  %297 = vmatpush.xpose.msk.msra.mxu0 %vm72_vm0, %v29_v19 }
  0x3e   :  { %323 = vmatpush.xpose.msk.msra.mxu3 %vm72_vm0, %v28_v22  ;;  %298 = vmatpush.xpose.msk.msra.mxu0 %vm72_vm0, %v28_v22 }
  0x41   :  { %300 = vmatmul.msk.f32.vlgmr.msra.gmra.mxu3 %vm72_vm0, %v45_v23  ;;  %299 = vmatmul.msk.f32.vlgmr.msra.gmra.mxu0 %vm72_vm0, %v44_v24 }
  0x49   :  { %301 = vmatmul.msk.f32.gmra.mxu3 %vm72_vm0, %v46_v25 }
  0x51   :  { %302 = vmatmul.msk.f32.gmra.mxu3 %vm72_vm0, %v47_v26 }
  0x66   :  { %v192_v51 = vpop.permute.xlu2 %191 }
  0x6e   :  { %v187_v53 = vpop.permute.xlu2 %186 }
  0x79   :  { %v70_v28 = vpop.permute.xlu0 %69 }
  0x7a   :  { %v60_v30 = vpop.permute.xlu1 %59 }
  0x81   :  { %v65_v31 = vpop.permute.xlu0 %64 }
  0x82   :  { %v55_v38 = vpop.permute.xlu1 %54 }
  0x89   :  { %v182_v57 = vpop.permute.xlu0 %181 }
  0x8a   :  { %v177_v60 = vpop.permute.xlu1 %176 }
  0xbe   :  { %v150_v35 = vpop.f32.mrf.mxu0 }
  0xbf   :  { %v151_v41 = vadd.f32 %v150_v35, %v55_v38 }
  0xc1   :  { %v162_v43 = vmax.f32 %v151_v41, 0.0 }
  0xc4   :  { %v153_v27 = vpop.f32.mrf.mxu3 }
  0xc5   :  { %v154_v36 = vadd.f32 %v153_v27, %v60_v30 }
  0xc7   :  { %v163_v42 = vmax.f32 %v154_v36, 0.0 }
  0xcc   :  { %v156_v29 = vpop.f32.mrf.mxu3 }
  0xcd   :  { %v157_v33 = vadd.f32 %v156_v29, %v65_v31 }
  0xcf   :  { %v164_v40 = vmax.f32 %v157_v33, 0.0 }
  0xd4   :  { %v159_v32 = vpop.f32.mrf.mxu3 }
  0xd5   :  { %v160_v34 = vadd.f32 %v159_v32, %v70_v28 }
  0xd7   :  { %v165_v37 = vmax.f32 %v160_v34, 0.0 }
  0xd9   :  { %219 = vmatpush.msra.mxu1 %v165_v37 }
  0xdb   :  { %220 = vmatpush.msra.mxu1 %v164_v40 }
  0xdd   :  { %221 = vmatpush.msra.mxu1 %v163_v42 }
  0xdf   :  { %222 = vmatpush.msra.mxu1 %v162_v43 }
  0xe0   :  { %303 = vmatmul.msk.f32.vlgmr.msra.gmra.mxu1 %vm194_vm1, %v166_v44 }
  0xe8   :  { %304 = vmatmul.msk.f32.gmra.mxu1 %vm194_vm1, %v167_v46 }
  0xf0   :  { %305 = vmatmul.msk.f32.gmra.mxu1 %vm194_vm1, %v168_v47 }
  0xf8   :  { %306 = vmatmul.msk.f32.gmra.mxu1 %vm194_vm1, %v169_v48 }
 0x15d   :  { %v224_v49 = vpop.f32.mrf.mxu1 }
 0x15e   :  { %v225_v61 = vadd.f32 %v224_v49, %v177_v60 }
 0x160   :  { %v236_v0 = vmax.f32 %v225_v61, 0.0 }
 0x165   :  { %v227_v50 = vpop.f32.mrf.mxu1 }
 0x166   :  { %v228_v58 = vadd.f32 %v227_v50, %v182_v57 }
 0x168   :  { %v237_v63 = vmax.f32 %v228_v58, 0.0 }
 0x16d   :  { %v230_v52 = vpop.f32.mrf.mxu1 }
 0x16e   :  { %v231_v55 = vadd.f32 %v230_v52, %v187_v53 }
 0x170   :  { %v238_v62 = vmax.f32 %v231_v55, 0.0 }
 0x175   :  { %v233_v54 = vpop.f32.mrf.mxu1 }
 0x176   :  { %v234_v56 = vadd.f32 %v233_v54, %v192_v51 }
 0x178   :  { %v239_v59 = vmax.f32 %v234_v56, 0.0 }
 0x17a   :  { %258 = vmatpush.msra.mxu2 %v239_v59 }
 0x17c   :  { %259 = vmatpush.msra.mxu2 %v238_v62 }
 0x17e   :  { %260 = vmatpush.msra.mxu2 %v237_v63 }
 0x180   :  { %261 = vmatpush.msra.mxu2 %v236_v0 }
 0x181   :  { %307 = vmatmul.msk.f32.vlgmr.msra.gmra.mxu2 %vm194_vm1, %v240_v1 }
 0x204   :  { %v263_v3 = vpop.f32.mrf.mxu2 }
 0x205   :  { %v264_v4 = vadd.f32 %v263_v3, %v242_v2 }
 0x207   :  { %266 = vst [vmem:[#allocation3] sm:$0x1] %v264_v4 }
 0x208   :  { %277 = dma.vmem_to_hbm [thread:$0]  %s273_s18, 16, %s275_s21, [#allocation4]  }
 0x209   :  { %353 = dma.done.wait [#allocation4], 16  }
 0x20a   :  { %354 = vsyncadd [#allocation4], 4294967280 }
 0x20b   :  { %282 = vsyncpa [#allocation4], 1 }

</bundles_post_ra>
